<compile_context>
chip_gen: v7x
topology: tpu7x:2x2x1
jax: 0.10.0
libtpu: 0.0.40
codegen_flags: <defaults>
</compile_context>

<pallas_src>
import jax
import jax.numpy as jnp
from jax.experimental import pallas as pl
from jax.experimental.pallas import tpu as pltpu


def _copy_kernel(x_ref, o_ref):
    # One full-width, unmasked VMEM copy of the current (tile_rows, H) block.
    o_ref[...] = x_ref[...]


def _sublane_granularity(dtype):
    """Minimum second-to-last block dim for this dtype's packed layout."""
    bits = jnp.dtype(dtype).itemsize * 8
    if bits >= 32:
        return 8
    if bits == 16:
        return 16
    return 32


def view_split_heads(x, target_shape):
    """Pallas equivalent of x.view(target_shape) for (B,S,H) -> (B,S,NH,HD)."""
    B, S, H = x.shape
    tB, tS, NH, HD = target_shape
    assert (tB, tS) == (B, S) and NH * HD == H, "incompatible view shape"

    # Metadata-only flatten to a lane-dense 2-D slab.
    rows = B * S
    x2d = jnp.reshape(x, (rows, H))

    itemsize = jnp.dtype(x.dtype).itemsize
    total_bytes = rows * H * itemsize
    sub = _sublane_granularity(x.dtype)

    # Block-byte budget: ~4x block bytes are in flight (double-buffered in +
    # out); 4 * 6 MiB = 24 MiB stays inside v7x's 32 MiB default scoped VMEM
    # (64 MiB physical) and is trivially fine on v5e/v6e (128 MiB).
    max_block_bytes = 6 * 1024 * 1024

    if total_bytes <= max_block_bytes or rows % sub != 0:
        # Single full-array block, one grid step: launch-overhead only, no
        # min-tile constraint (full-extent block is always legal).
        tile_rows = rows
    else:
        # Largest multiple-of-`sub` divisor of `rows` whose block fits budget.
        cap_rows = max(sub, (max_block_bytes // (H * itemsize)) // sub * sub)
        cap_rows = min(cap_rows, rows)
        tile_rows = rows
        for t in range(cap_rows - cap_rows % sub, sub - 1, -sub):
            if t > 0 and rows % t == 0:
                tile_rows = t
                break

    grid = (rows // tile_rows,)

    flat = pl.pallas_call(
        _copy_kernel,
        out_shape=jax.ShapeDtypeStruct((rows, H), x.dtype),
        grid=grid,
        in_specs=[pl.BlockSpec((tile_rows, H), lambda i: (i, 0))],
        out_specs=pl.BlockSpec((tile_rows, H), lambda i: (i, 0)),
        compiler_params=pltpu.CompilerParams(
            dimension_semantics=("arbitrary",),
        ),
    )(x2d)

    # The split-heads view itself is a free, metadata-only reshape in XLA.
    return jnp.reshape(flat, target_shape)


if __name__ == "__main__":
    # Small shapes consistent with the module's (1, 384, 768) -> (1, 384, 12, 64):
    # batch=1, seq=16, heads=4, head_dim=64 -> hidden=256.
    B, S, NH, HD = 1, 16, 4, 64
    H = NH * HD

    key = jax.random.PRNGKey(0)
    x113 = jax.random.normal(key, (B, S, H), dtype=jnp.float32)
    x128 = (B, S, NH, HD)

    ref = jnp.reshape(x113, x128)

    y = view_split_heads(x113, x128)
    y = jax.block_until_ready(y)

    assert y.shape == x128
    assert bool(jnp.array_equal(y, ref))

    print("KERNEL_OK")
</pallas_src>

<mosaic_0001>
module attributes {stable_mosaic.version = 11 : i64} {
  func.func @_copy_kernel(%arg0: i32, %arg1: memref<16x256xf32, #tpu.memory_space<vmem>>, %arg2: memref<16x256xf32, #tpu.memory_space<vmem>>) attributes {dimension_semantics = [#tpu.dimension_semantics<arbitrary>], iteration_bounds = array<i64: 1>, scalar_prefetch = 0 : i64, scratch_operands = 0 : i64, tpu.core_type = #tpu.core_type<tc>, window_params = [{transform_indices = @transform_0, window_bounds = array<i64: 16, 256>}, {transform_indices = @transform_1, window_bounds = array<i64: 16, 256>}]} {
    %c0 = arith.constant 0 : index
    %c0_0 = arith.constant 0 : index
    %0 = vector.load %arg1[%c0, %c0_0] : memref<16x256xf32, #tpu.memory_space<vmem>>, vector<16x256xf32>
    %c0_1 = arith.constant 0 : index
    %c0_2 = arith.constant 0 : index
    %1 = vector.load %arg2[%c0_1, %c0_2] : memref<16x256xf32, #tpu.memory_space<vmem>>, vector<16x256xf32>
    tpu.vector_store %arg2[%c0_1, %c0_2], %0 {strides = array<i32>} : memref<16x256xf32, #tpu.memory_space<vmem>>, vector<16x256xf32>,
    return
  }
  func.func @transform_0(%arg0: i32) -> (i32, i32) {
    %c0_i32 = arith.constant 0 : i32
    %c0_i32_0 = arith.constant 0 : i32
    return %arg0, %c0_i32 : i32, i32
  }
  func.func @transform_1(%arg0: i32) -> (i32, i32) {
    %c0_i32 = arith.constant 0 : i32
    %c0_i32_0 = arith.constant 0 : i32
    return %arg0, %c0_i32 : i32, i32
  }
}

</mosaic_0001>

<bundles_post_ra>
// kernel: tpu_custom_call.1
= control target key start
LH: loop header
LB: loop body
LE: loop exit
PB: predicated region body
PF: predicated region fallthrough
CT: control target
= control target key end

     0   :  { %6 = vsyncpa [#allocation3], 0  ;;  %s144_s0 = inlined_call_operand.hbm [shape: f32[16,256], index: 0, kind: input, shape index: {}]   ;;  %s145_s1 = inlined_call_operand.hbm [shape: f32[16,256], index: 1, kind: output, shape index: {}]  }
   0x1   :  { %7 = vsyncpa [#allocation4], 0  ;;  %s100_s6 = smov [#allocation2]   ;;  %s52_s10 = scalar_lea.hbm %s144_s0, 512 }
   0x2   :  { %s13_s7 = sshll.u32 %s100_s6, 4  ;;  %p53_p0 = scmp.ne.s32.totalorder %s144_s0, %s52_s10  ;;  %s14_s7 = int_to_ptr.vmem [resolvable:$true] %s13_s7 }
   0x3   :  { %p56_p1 = scmp.lt.u32.totalorder %s52_s10, %s144_s0 }
   0x5   :  { %p58_p2 = pnand %p56_p1, %p53_p0 }
   0x7   :  { %61 = shalt.err (!%p58_p2)
}
   0x8   :  { %s62_s15 = scalar_lea.vmem %s14_s7, 512  ;;  %p67_p4 = scmp.lt.s32.totalorder %s14_s7, %s14_s7 }
   0x9   :  { %p63_p3 = scmp.ne.s32.totalorder %s14_s7, %s62_s15  ;;  %p68_p5 = scmp.lt.s32.totalorder %s62_s15, %s62_s15 }
   0xb   :  { %p69_p6 = por %p68_p5, %p67_p4 }
   0xd   :  { %p70_p7 = pnand %p69_p6, %p63_p3 }
   0xf   :  { %73 = shalt.err (!%p70_p7)
}
  0x10   :  { %s101_s16 = smov 256   ;;  %s102_s17 = smov 16  }
  0x11   :  { %19 = dma.hbm_to_vmem [thread:$0]  %s144_s0, 512, %s14_s7, [#allocation3], %s101_s16, %s101_s16, %s102_s17  }
  0x12   :  { %96 = dma.done.wait [#allocation3], 512  }
  0x13   :  { %97 = vsyncadd [#allocation3], 4294966784  ;;  %s103_s20 = smov [#allocation5]   ;;  %v23_v0 = vld [vmem:[#allocation2] sm:$0xff]  ;;  %v24_v1 = vld [vmem:[#allocation2 + $0x8] sm:$0xff] }
  0x14   :  { %s36_s21 = sshll.u32 %s103_s20, 4  ;;  %v25_v2 = vld [vmem:[#allocation2 + $0x10] sm:$0xff]  ;;  %27 = vst [vmem:[#allocation5] sm:$0xff] %v23_v0  ;;  %28 = vst [vmem:[#allocation5 + $0x8] sm:$0xff] %v24_v1  ;;  %v26_v3 = vld [vmem:[#allocation2 + $0x18] sm:$0xff]  ;;  %s37_s21 = int_to_ptr.vmem [resolvable:$true] %s36_s21 }
  0x15   :  { %29 = vst [vmem:[#allocation5 + $0x10] sm:$0xff] %v25_v2  ;;  %30 = vst [vmem:[#allocation5 + $0x18] sm:$0xff] %v26_v3  ;;  %s74_s22 = scalar_lea.vmem %s37_s21, 512  ;;  %p79_p9 = scmp.lt.s32.totalorder %s37_s21, %s37_s21 }
  0x16   :  { %p75_p8 = scmp.ne.s32.totalorder %s37_s21, %s74_s22  ;;  %p80_p10 = scmp.lt.s32.totalorder %s74_s22, %s74_s22 }
  0x18   :  { %p81_p11 = por %p80_p10, %p79_p9 }
  0x1a   :  { %p82_p12 = pnand %p81_p11, %p75_p8 }
  0x1c   :  { %85 = shalt.err (!%p82_p12)
}
  0x1d   :  { %s86_s24 = scalar_lea.hbm %s145_s1, 512 }
  0x1e   :  { %p87_p13 = scmp.ne.s32.totalorder %s145_s1, %s86_s24  ;;  %p90_p0 = scmp.lt.u32.totalorder %s86_s24, %s145_s1 }
  0x20   :  { %p92_p1 = pnand %p90_p0, %p87_p13 }
  0x22   :  { %95 = shalt.err (!%p92_p1)
}
  0x23   :  { %42 = dma.vmem_to_hbm [thread:$0]  %s37_s21, 512, %s145_s1, [#allocation4], %s101_s16, %s101_s16, %s102_s17  }
  0x24   :  { %98 = dma.done.wait [#allocation4], 512  }
  0x25   :  { %99 = vsyncadd [#allocation4], 4294966784 }
  0x26   :  { %46 = vsyncpa [#allocation3], 1 }
  0x27   :  { %47 = vsyncpa [#allocation4], 1 }

</bundles_post_ra>
